<compile_context>
chip_gen: v5e
topology: v5e:2x2
jax: 0.10.0
libtpu: 0.0.40
codegen_flags: <defaults>
</compile_context>

<pallas_src>
import functools

import jax
import jax.numpy as jnp
from jax.experimental import pallas as pl
from jax.experimental.pallas import tpu as pltpu

_MiB = 1024 * 1024


# ------------------------------- helpers ----------------------------------- #

def _physical_vmem_bytes():
    """Per-TensorCore VMEM capacity; conservative fallback if unqueryable."""
    try:
        return int(pltpu.get_tpu_info().vmem_capacity_bytes)
    except Exception:
        return 64 * _MiB  # v7x per-core size — the smallest of v5e/v6e/v7x


def _row_tile(L, cap):
    """Largest row tile: full L if small, else a multiple-of-8 divisor <= cap."""
    if L <= cap:
        return L
    for t in range(cap, 7, -8):
        if L % t == 0:
            return t
    # TODO(synk): pad awkward L instead of falling back to a full-L block.
    return L


def _compiler_params(block_bytes, scratch_bytes=0):
    """Both grid axes parallel (megacore) + a VMEM limit sized to the blocks."""
    phys = _physical_vmem_bytes()
    limit = int(2.5 * block_bytes) + scratch_bytes + 2 * _MiB  # 2x buf + headroom
    limit = max(limit, 32 * _MiB)
    limit = min(limit, max(phys - 4 * _MiB, 32 * _MiB))
    return pltpu.CompilerParams(
        dimension_semantics=("parallel", "parallel"),
        vmem_limit_bytes=limit)


# ----------------------------- Pallas kernels ------------------------------ #

def _linear_kernel(x_ref, w_ref, b_ref, o_ref, *, compute_dtype):
    # x: (1, tm, Cin), w: (Cin, Cout) [already compute_dtype], b: (1, Cout) f32.
    x = x_ref[0].astype(compute_dtype)
    y = jnp.dot(x, w_ref[...], preferred_element_type=jnp.float32) + b_ref[...]
    o_ref[0] = y.astype(o_ref.dtype)


def _linear_ape_kernel(x_ref, ape_ref, w_ref, b_ref, o_ref, *, compute_dtype):
    # APE add fused into the projection (free VPU work under the MXU matmul).
    x = (x_ref[0] + ape_ref[0]).astype(compute_dtype)
    y = jnp.dot(x, w_ref[...], preferred_element_type=jnp.float32) + b_ref[...]
    o_ref[0] = y.astype(o_ref.dtype)


def _kv_proj_kernel(kv_ref, wk_ref, bk_ref, wv_ref, bv_ref, k_ref, v_ref,
                    *, compute_dtype):
    # Fused K/V projection: kv read once, two MXU dots, two outputs.
    kvc = kv_ref[0].astype(compute_dtype)
    k_ref[0] = (jnp.dot(kvc, wk_ref[...], preferred_element_type=jnp.float32)
                + bk_ref[...]).astype(k_ref.dtype)
    v_ref[0] = (jnp.dot(kvc, wv_ref[...], preferred_element_type=jnp.float32)
                + bv_ref[...]).astype(v_ref.dtype)


def _kv_proj_ape_kernel(kv_ref, kape_ref, wk_ref, bk_ref, wv_ref, bv_ref,
                        k_ref, v_ref, *, compute_dtype):
    kv = kv_ref[0]
    k_in = (kv + kape_ref[0]).astype(compute_dtype)   # K uses kv + k_ape
    kvc = kv.astype(compute_dtype)                    # V uses raw kv
    k_ref[0] = (jnp.dot(k_in, wk_ref[...], preferred_element_type=jnp.float32)
                + bk_ref[...]).astype(k_ref.dtype)
    v_ref[0] = (jnp.dot(kvc, wv_ref[...], preferred_element_type=jnp.float32)
                + bv_ref[...]).astype(v_ref.dtype)


def _make_attn_kernel(has_pos, num_heads, head_dim, compute_dtype):
    """Attention (all heads per step) + fused output projection.

    Refs per grid step (b, i):
      q : (1, tq, C)   k, v : (1, Lkv, C)   [pos : (1, H, tq, Lkv), source dtype]
      wp: (C, C) compute_dtype   bp : (1, C) f32   o : (1, tq, C)
      x_scr : (tq, C) compute_dtype VMEM scratch (per-head writes; no concat).
    The 1/sqrt(D) scale is pre-folded into wq/bq, so scores need no scaling here.
    """

    def attn_body(q_ref, k_ref, v_ref, pos_ref, wp_ref, bp_ref, o_ref, x_scr):
        q = q_ref[0]      # (tq, C)  compute_dtype
        k = k_ref[0]      # (Lkv, C) compute_dtype
        v = v_ref[0]      # (Lkv, C) compute_dtype

        for h in range(num_heads):                       # static unroll
            sl = slice(h * head_dim, (h + 1) * head_dim)
            # Contract last dims directly — no materialized k.T.
            s = jax.lax.dot_general(
                q[:, sl], k[:, sl], (((1,), (1,)), ((), ())),
                preferred_element_type=jnp.float32)      # (tq, Lkv) f32
            if pos_ref is not None:
                s = s + pos_ref[0, h].astype(jnp.float32)
            m = jnp.max(s, axis=-1, keepdims=True)
            p = jnp.exp(s - m)                           # unnormalized probs
            denom = jnp.sum(p, axis=-1, keepdims=True)   # (tq, 1)
            o_h = jnp.dot(p.astype(compute_dtype), v[:, sl],
                          preferred_element_type=jnp.float32)  # (tq, D)
            # Normalize AFTER the PV matmul: (tq, D) multiplies, not (tq, Lkv).
            o_h = o_h * pl.reciprocal(denom, approx=True)      # EUP slot
            x_scr[:, sl] = o_h.astype(compute_dtype)

        # Fused output projection — full-depth (C) MXU matmul from VMEM scratch;
        # the attention activation never leaves VMEM.
        y = jnp.dot(x_scr[...], wp_ref[...],
                    preferred_element_type=jnp.float32) + bp_ref[...]
        o_ref[0] = y.astype(o_ref.dtype)

    if has_pos:
        def kernel(q_ref, k_ref, v_ref, pos_ref, wp_ref, bp_ref, o_ref, x_scr):
            attn_body(q_ref, k_ref, v_ref, pos_ref, wp_ref, bp_ref, o_ref, x_scr)
    else:
        def kernel(q_ref, k_ref, v_ref, wp_ref, bp_ref, o_ref, x_scr):
            attn_body(q_ref, k_ref, v_ref, None, wp_ref, bp_ref, o_ref, x_scr)
    return kernel


# ------------------------------ wrappers ----------------------------------- #

def _q_projection(x, ape, w, b, *, compute_dtype):
    B, L, Cin = x.shape
    Cout = w.shape[1]
    tm = _row_tile(L, 512)
    grid = (B, L // tm)
    b2d = b.reshape(1, Cout)

    cd = jnp.dtype(compute_dtype).itemsize
    blk = (tm * Cin * x.dtype.itemsize + Cin * Cout * cd + Cout * 4
           + tm * Cout * cd)
    if ape is not None:
        blk += tm * Cin * ape.dtype.itemsize
    cp = _compiler_params(blk)

    x_spec = pl.BlockSpec((1, tm, Cin), lambda bi, i: (bi, i, 0))
    w_spec = pl.BlockSpec((Cin, Cout), lambda bi, i: (0, 0))
    b_spec = pl.BlockSpec((1, Cout), lambda bi, i: (0, 0))
    o_spec = pl.BlockSpec((1, tm, Cout), lambda bi, i: (bi, i, 0))
    out_shape = jax.ShapeDtypeStruct((B, L, Cout), compute_dtype)

    if ape is None:
        kernel = functools.partial(_linear_kernel, compute_dtype=compute_dtype)
        return pl.pallas_call(kernel, out_shape=out_shape, grid=grid,
                              in_specs=[x_spec, w_spec, b_spec],
                              out_specs=o_spec, compiler_params=cp)(x, w, b2d)

    if ape.shape[0] == 1:   # broadcast over batch handled by index_map (no copy)
        ape_spec = pl.BlockSpec((1, tm, Cin), lambda bi, i: (0, i, 0))
    else:
        ape_spec = pl.BlockSpec((1, tm, Cin), lambda bi, i: (bi, i, 0))
    kernel = functools.partial(_linear_ape_kernel, compute_dtype=compute_dtype)
    return pl.pallas_call(kernel, out_shape=out_shape, grid=grid,
                          in_specs=[x_spec, ape_spec, w_spec, b_spec],
                          out_specs=o_spec, compiler_params=cp)(x, ape, w, b2d)


def _kv_projection(kv, k_ape, wk, bk, wv, bv, *, compute_dtype):
    B, L, C = kv.shape
    Ck, Cv = wk.shape[1], wv.shape[1]
    tm = _row_tile(L, 512)
    grid = (B, L // tm)
    bk2 = bk.reshape(1, Ck)
    bv2 = bv.reshape(1, Cv)

    cd = jnp.dtype(compute_dtype).itemsize
    blk = (tm * C * kv.dtype.itemsize + C * (Ck + Cv) * cd + (Ck + Cv) * 4
           + tm * (Ck + Cv) * cd)
    if k_ape is not None:
        blk += tm * C * k_ape.dtype.itemsize
    cp = _compiler_params(blk)

    kv_spec = pl.BlockSpec((1, tm, C), lambda bi, i: (bi, i, 0))
    wk_spec = pl.BlockSpec((C, Ck), lambda bi, i: (0, 0))
    bk_spec = pl.BlockSpec((1, Ck), lambda bi, i: (0, 0))
    wv_spec = pl.BlockSpec((C, Cv), lambda bi, i: (0, 0))
    bv_spec = pl.BlockSpec((1, Cv), lambda bi, i: (0, 0))
    ko_spec = pl.BlockSpec((1, tm, Ck), lambda bi, i: (bi, i, 0))
    vo_spec = pl.BlockSpec((1, tm, Cv), lambda bi, i: (bi, i, 0))
    out_shape = (jax.ShapeDtypeStruct((B, L, Ck), compute_dtype),
                 jax.ShapeDtypeStruct((B, L, Cv), compute_dtype))

    if k_ape is None:
        kernel = functools.partial(_kv_proj_kernel, compute_dtype=compute_dtype)
        return pl.pallas_call(kernel, out_shape=out_shape, grid=grid,
                              in_specs=[kv_spec, wk_spec, bk_spec, wv_spec, bv_spec],
                              out_specs=(ko_spec, vo_spec),
                              compiler_params=cp)(kv, wk, bk2, wv, bv2)

    if k_ape.shape[0] == 1:
        ape_spec = pl.BlockSpec((1, tm, C), lambda bi, i: (0, i, 0))
    else:
        ape_spec = pl.BlockSpec((1, tm, C), lambda bi, i: (bi, i, 0))
    kernel = functools.partial(_kv_proj_ape_kernel, compute_dtype=compute_dtype)
    return pl.pallas_call(kernel, out_shape=out_shape, grid=grid,
                          in_specs=[kv_spec, ape_spec, wk_spec, bk_spec,
                                    wv_spec, bv_spec],
                          out_specs=(ko_spec, vo_spec),
                          compiler_params=cp)(kv, k_ape, wk, bk2, wv, bv2)


def _attention_and_proj(qp, kp, vp, attn_pos, wp, bp, *, num_heads,
                        compute_dtype, out_dtype):
    B, Lq, C = qp.shape
    Lkv = kp.shape[1]
    D = C // num_heads
    # Generation-dependent tile cap: 256 on 64 MiB VMEM (v7x), 512 on 128 MiB.
    cap = 512 if _physical_vmem_bytes() >= 100 * _MiB else 256
    tq = _row_tile(Lq, cap)
    grid = (B, Lq // tq)
    bp2 = bp.reshape(1, C)

    cd = jnp.dtype(compute_dtype).itemsize
    blk = (tq * C * cd + 2 * Lkv * C * cd + C * C * cd + C * 4
           + tq * C * jnp.dtype(out_dtype).itemsize)
    if attn_pos is not None:
        blk += num_heads * tq * Lkv * attn_pos.dtype.itemsize
    scratch_bytes = tq * C * cd
    cp = _compiler_params(blk, scratch_bytes)

    q_spec = pl.BlockSpec((1, tq, C), lambda bi, i: (bi, i, 0))
    kv_spec = pl.BlockSpec((1, Lkv, C), lambda bi, i: (bi, 0, 0))
    w_spec = pl.BlockSpec((C, C), lambda bi, i: (0, 0))
    b_spec = pl.BlockSpec((1, C), lambda bi, i: (0, 0))
    o_spec = pl.BlockSpec((1, tq, C), lambda bi, i: (bi, i, 0))
    out_shape = jax.ShapeDtypeStruct((B, Lq, C), out_dtype)
    scratch = [pltpu.VMEM((tq, C), compute_dtype)]

    if attn_pos is None:
        kernel = _make_attn_kernel(False, num_heads, D, compute_dtype)
        return pl.pallas_call(kernel, out_shape=out_shape, grid=grid,
                              in_specs=[q_spec, kv_spec, kv_spec, w_spec, b_spec],
                              out_specs=o_spec, scratch_shapes=scratch,
                              compiler_params=cp)(qp, kp, vp, wp, bp2)

    # attn_pos DMA'd in its source dtype; per-head slice cast to f32 in-kernel.
    if attn_pos.shape[0] == 1:   # batch broadcast via index_map — no HBM copy
        pos_spec = pl.BlockSpec((1, num_heads, tq, Lkv), lambda bi, i: (0, 0, i, 0))
    else:
        pos_spec = pl.BlockSpec((1, num_heads, tq, Lkv), lambda bi, i: (bi, 0, i, 0))
    kernel = _make_attn_kernel(True, num_heads, D, compute_dtype)
    return pl.pallas_call(kernel, out_shape=out_shape, grid=grid,
                          in_specs=[q_spec, kv_spec, kv_spec, pos_spec,
                                    w_spec, b_spec],
                          out_specs=o_spec, scratch_shapes=scratch,
                          compiler_params=cp)(qp, kp, vp, attn_pos, wp, bp2)


def cross_attention_forward(params, q, kv, q_ape, k_ape, attn_pos, *,
                            num_heads, compute_dtype=jnp.bfloat16):
    """Pallas CrossAttention.forward (attn_pos_encoding_only=False path).

    compute_dtype is the MXU operand dtype (bf16 recommended on v5e/v6e/v7x);
    all matmuls accumulate in f32. Use compute_dtype=jnp.float32 for bitwise-
    closer results at ~3x MXU cost.
    """
    B, Lq, C = q.shape
    assert C % num_heads == 0
    D = C // num_heads
    scale = D ** (-0.5)

    # Fold the 1/sqrt(D) scale into the Q projection, and pre-cast weights to
    # compute_dtype ONCE (they are revisited every grid step — this removes the
    # per-step weight cast and halves weight DMA / resident VMEM).
    wq = (params["wq"].astype(jnp.float32) * scale).astype(compute_dtype)
    bq = params["bq"].astype(jnp.float32) * scale
    wk = params["wk"].astype(compute_dtype)
    wv = params["wv"].astype(compute_dtype)
    wp = params["wp"].astype(compute_dtype)
    bk = params["bk"].astype(jnp.float32)
    bv = params["bv"].astype(jnp.float32)
    bp = params["bp"].astype(jnp.float32)

    # Q projection (+ fused q_ape add, scale folded in).
    qp = _q_projection(q, q_ape, wq, bq, compute_dtype=compute_dtype)
    # Fused K/V projection (+ fused k_ape add on the K path).
    kp, vp = _kv_projection(kv, k_ape, wk, bk, wv, bv,
                            compute_dtype=compute_dtype)
    # Multi-head attention (+ untied positional bias) + fused output projection.
    return _attention_and_proj(qp, kp, vp, attn_pos, wp, bp,
                               num_heads=num_heads, compute_dtype=compute_dtype,
                               out_dtype=q.dtype)


# --------------------------- pure-JAX reference ----------------------------- #

def reference_forward(params, q, kv, q_ape, k_ape, attn_pos, *, num_heads):
    B, Lq, C = q.shape
    Lkv = kv.shape[1]
    D = C // num_heads
    scale = D ** (-0.5)
    q_in = q + q_ape if q_ape is not None else q
    k_in = kv + k_ape if k_ape is not None else kv
    qp = q_in @ params["wq"] + params["bq"]
    kp = k_in @ params["wk"] + params["bk"]
    vp = kv @ params["wv"] + params["bv"]
    qh = qp.reshape(B, Lq, num_heads, D).transpose(0, 2, 1, 3)
    kh = kp.reshape(B, Lkv, num_heads, D).transpose(0, 2, 1, 3)
    vh = vp.reshape(B, Lkv, num_heads, D).transpose(0, 2, 1, 3)
    attn = jnp.einsum("bhqd,bhkd->bhqk", qh, kh) * scale
    if attn_pos is not None:
        attn = attn + attn_pos
    attn = jax.nn.softmax(attn, axis=-1)
    x = jnp.einsum("bhqk,bhkd->bhqd", attn, vh)
    x = x.transpose(0, 2, 1, 3).reshape(B, Lq, C)
    return x @ params["wp"] + params["bp"]


# --------------------------------- main ------------------------------------ #

if __name__ == "__main__":
    B, Lq, Lkv = 2, 16, 8
    C, num_heads = 32, 4
    qkv_bias = False  # PyTorch default

    key = jax.random.PRNGKey(0)
    keys = jax.random.split(key, 10)

    # Parameters (deterministic init). Weights stored as (C_in, C_out).
    params = {
        "wq": jax.random.normal(keys[0], (C, C), jnp.float32) * 0.05,
        "wk": jax.random.normal(keys[1], (C, C), jnp.float32) * 0.05,
        "wv": jax.random.normal(keys[2], (C, C), jnp.float32) * 0.05,
        "wp": jax.random.normal(keys[3], (C, C), jnp.float32) * 0.05,
        "bq": jnp.zeros((C,), jnp.float32) if not qkv_bias
              else jax.random.normal(keys[4], (C,), jnp.float32) * 0.05,
        "bk": jnp.zeros((C,), jnp.float32) if not qkv_bias
              else jax.random.normal(keys[5], (C,), jnp.float32) * 0.05,
        "bv": jnp.zeros((C,), jnp.float32) if not qkv_bias
              else jax.random.normal(keys[6], (C,), jnp.float32) * 0.05,
        "bp": jax.random.normal(keys[7], (C,), jnp.float32) * 0.05,
    }

    # Inputs.
    ikeys = jax.random.split(keys[8], 5)
    q = jax.random.normal(ikeys[0], (B, Lq, C), jnp.float32)
    kv = jax.random.normal(ikeys[1], (B, Lkv, C), jnp.float32)
    q_ape = jax.random.normal(ikeys[2], (1, Lq, C), jnp.float32)
    k_ape = jax.random.normal(ikeys[3], (1, Lkv, C), jnp.float32)
    attn_pos = jax.random.normal(ikeys[4], (1, num_heads, Lq, Lkv), jnp.float32)

    # 1) f32 compute path — tight check (tolerance covers approx reciprocal).
    out_f32 = cross_attention_forward(params, q, kv, q_ape, k_ape, attn_pos,
                                      num_heads=num_heads,
                                      compute_dtype=jnp.float32)
    out_f32 = jax.block_until_ready(out_f32)
    ref = reference_forward(params, q, kv, q_ape, k_ape, attn_pos,
                            num_heads=num_heads)
    assert out_f32.shape == (B, Lq, C)
    assert jnp.allclose(out_f32, ref, atol=5e-3, rtol=5e-3), "f32 mismatch"

    # 1b) f32 path without APE / attn_pos (exercises the other kernel variants).
    out_np = cross_attention_forward(params, q, kv, None, None, None,
                                     num_heads=num_heads,
                                     compute_dtype=jnp.float32)
    out_np = jax.block_until_ready(out_np)
    ref_np = reference_forward(params, q, kv, None, None, None,
                               num_heads=num_heads)
    assert jnp.allclose(out_np, ref_np, atol=5e-3, rtol=5e-3), "no-pos mismatch"

    # 2) Default bf16 compute path — bf16-aware tolerance.
    out_bf16 = cross_attention_forward(params, q, kv, q_ape, k_ape, attn_pos,
                                       num_heads=num_heads)
    out_bf16 = jax.block_until_ready(out_bf16)
    assert out_bf16.shape == (B, Lq, C)
    assert jnp.allclose(out_bf16, ref, atol=5e-2, rtol=5e-2), "bf16 mismatch"

    print("KERNEL_OK")
</pallas_src>

<mosaic_0001>
module attributes {stable_mosaic.version = 11 : i64} {
  func.func @_linear_ape_kernel(%arg0: i32, %arg1: i32, %arg2: memref<1x16x32xf32, #tpu.memory_space<vmem>>, %arg3: memref<1x16x32xf32, #tpu.memory_space<vmem>>, %arg4: memref<32x32xf32, #tpu.memory_space<vmem>>, %arg5: memref<1x32xf32, #tpu.memory_space<vmem>>, %arg6: memref<1x16x32xf32, #tpu.memory_space<vmem>>) attributes {dimension_semantics = [#tpu.dimension_semantics<parallel>, #tpu.dimension_semantics<parallel>], iteration_bounds = array<i64: 2, 1>, scalar_prefetch = 0 : i64, scratch_operands = 0 : i64, tpu.core_type = #tpu.core_type<tc>, window_params = [{transform_indices = @transform_0, window_bounds = array<i64: 1, 16, 32>}, {transform_indices = @transform_1, window_bounds = array<i64: 1, 16, 32>}, {pipeline_mode = #tpu.pipeline_mode<synchronous>, transform_indices = @transform_2, window_bounds = array<i64: 32, 32>}, {pipeline_mode = #tpu.pipeline_mode<synchronous>, transform_indices = @transform_3, window_bounds = array<i64: 1, 32>}, {transform_indices = @transform_4, window_bounds = array<i64: 1, 16, 32>}]} {
    %c0 = arith.constant 0 : index
    %c0_0 = arith.constant 0 : index
    %c0_1 = arith.constant 0 : index
    %0 = vector.load %arg2[%c0, %c0_0, %c0_1] : memref<1x16x32xf32, #tpu.memory_space<vmem>>, vector<1x16x32xf32>
    %1 = vector.shape_cast %0 : vector<1x16x32xf32> to vector<16x32xf32>
    %c0_2 = arith.constant 0 : index
    %c0_3 = arith.constant 0 : index
    %c0_4 = arith.constant 0 : index
    %2 = vector.load %arg3[%c0_2, %c0_3, %c0_4] : memref<1x16x32xf32, #tpu.memory_space<vmem>>, vector<1x16x32xf32>
    %3 = vector.shape_cast %2 : vector<1x16x32xf32> to vector<16x32xf32>
    %4 = arith.addf %1, %3 : vector<16x32xf32>
    %c0_5 = arith.constant 0 : index
    %c0_6 = arith.constant 0 : index
    %5 = vector.load %arg4[%c0_5, %c0_6] : memref<32x32xf32, #tpu.memory_space<vmem>>, vector<32x32xf32>
    %cst = arith.constant dense<0.000000e+00> : vector<16x32xf32>
    %6 = tpu.matmul %4, %5, %cst {dimension_numbers = #tpu.dot_dimension_numbers<[1], [0], [0], [1], [0, 0, 1, 1], [], []>} : vector<16x32xf32>, vector<32x32xf32>, vector<16x32xf32> -> vector<16x32xf32>
    %c0_7 = arith.constant 0 : index
    %c0_8 = arith.constant 0 : index
    %7 = vector.load %arg5[%c0_7, %c0_8] : memref<1x32xf32, #tpu.memory_space<vmem>>, vector<1x32xf32>
    %8 = vector.broadcast %7 : vector<1x32xf32> to vector<16x32xf32>
    %9 = arith.addf %6, %8 : vector<16x32xf32>
    %c0_9 = arith.constant 0 : index
    %c0_10 = arith.constant 0 : index
    %c0_11 = arith.constant 0 : index
    %10 = vector.load %arg6[%c0_9, %c0_10, %c0_11] : memref<1x16x32xf32, #tpu.memory_space<vmem>>, vector<1x16x32xf32>
    %11 = vector.shape_cast %10 : vector<1x16x32xf32> to vector<16x32xf32>
    %12 = vector.shape_cast %9 : vector<16x32xf32> to vector<1x16x32xf32>
    tpu.vector_store %arg6[%c0_9, %c0_10, %c0_11], %12 {strides = array<i32>} : memref<1x16x32xf32, #tpu.memory_space<vmem>>, vector<1x16x32xf32>,
    return
  }
  func.func @transform_0(%arg0: i32, %arg1: i32) -> (i32, i32, i32) {
    %c0_i32 = arith.constant 0 : i32
    %c0_i32_0 = arith.constant 0 : i32
    return %arg0, %arg1, %c0_i32 : i32, i32, i32
  }
  func.func @transform_1(%arg0: i32, %arg1: i32) -> (i32, i32, i32) {
    %c0_i32 = arith.constant 0 : i32
    %c0_i32_0 = arith.constant 0 : i32
    %c0_i32_1 = arith.constant 0 : i32
    return %c0_i32, %arg1, %c0_i32_0 : i32, i32, i32
  }
  func.func @transform_2(%arg0: i32, %arg1: i32) -> (i32, i32) {
    %c0_i32 = arith.constant 0 : i32
    %c0_i32_0 = arith.constant 0 : i32
    %c0_i32_1 = arith.constant 0 : i32
    return %c0_i32, %c0_i32_0 : i32, i32
  }
  func.func @transform_3(%arg0: i32, %arg1: i32) -> (i32, i32) {
    %c0_i32 = arith.constant 0 : i32
    %c0_i32_0 = arith.constant 0 : i32
    %c0_i32_1 = arith.constant 0 : i32
    return %c0_i32, %c0_i32_0 : i32, i32
  }
  func.func @transform_4(%arg0: i32, %arg1: i32) -> (i32, i32, i32) {
    %c0_i32 = arith.constant 0 : i32
    %c0_i32_0 = arith.constant 0 : i32
    return %arg0, %arg1, %c0_i32 : i32, i32, i32
  }
}

</mosaic_0001>

<bundles_post_ra>
// kernel: tpu_custom_call.1
= control target key start
LH: loop header
LB: loop body
LE: loop exit
PB: predicated region body
PF: predicated region fallthrough
CT: control target
= control target key end

     0   :  { %s942_s0 = inlined_call_operand.hbm [shape: f32[2,16,32], index: 0, kind: input, shape index: {}]   ;;  %s943_s1 = inlined_call_operand.hbm [shape: f32[1,16,32], index: 1, kind: input, shape index: {}]   ;;  %s944_s2 = inlined_call_operand.hbm [shape: f32[32,32], index: 2, kind: input, shape index: {}]   ;;  %s945_s3 = inlined_call_operand.vmem [shape: f32[1,32], index: 3, kind: input, shape index: {}]   ;;  %s946_s4 = inlined_call_operand.hbm [shape: f32[2,16,32], index: 4, kind: output, shape index: {}]  }
   0x1   :  { %948 = sst [smem:[#allocation12_spill]] %s943_s1 }
   0x2   :  { %9 = vsyncpa [#allocation3], 0 }
   0x3   :  { %11 = vsyncpa [#allocation3 + $0x1], 0 }
   0x4   :  { %12 = vsyncpa [#allocation6], 0 }
   0x5   :  { %13 = vsyncpa [#allocation4], 0 }
   0x6   :  { %15 = vsyncpa [#allocation4 + $0x1], 0  ;;  %s776_s15 = smov 0   ;;  %s778_s16 = smov 0  }
   0x7   :  { %s780_s17 = smov 0   ;;  %s782_s18 = smov 0  }
   0x8   :  { %s784_s19 = smov 0   ;;  %s786_s20 = smov 0  }
   0x9 LB: > { %s452_s21 = sadd.s32 4294967295, %s743_s20   ;;  %s453_s22 = sadd.s32 4294967294, %s743_s20   ;;  %s743_s20 = sphi %s786_s20, %s21_s20   ;;  %s739_s19 = sphi %s784_s19, %s960_s19   ;;  %s735_s18 = sphi %s782_s18, %s959_s18   ;;  %s731_s17 = sphi %s780_s17, %s958_s17   ;;  %s727_s16 = sphi %s778_s16, %s957_s16   ;;  %s723_s15 = sphi %s776_s15, %s956_s15  }
   0xa   : > { %p55_p0 = scmp.ne.s32.totalorder %s727_s16, %s723_s15  ;;  %p812_p1 = scmp.eq.s32.totalorder %s452_s21, 0 }
   0xb   : > { %p155_p2 = scmp.eq.s32.totalorder %s453_s22, 1  ;;  %p454_p4 = scmp.ge.s32.totalorder %s743_s20, 1 }
   0xc   : > { %p818_p3 = por %p812_p1, %p55_p0  ;;  %p162_p6 = scmp.lt.s32.totalorder %s743_s20, 3 }
   0xd   : > { %p823_p5 = por %p155_p2, %p55_p0  ;;  %s952_s1 = sld [smem:[#allocation12_spill]] }
   0xe   : > { %p831_p7 = pnand %p454_p4, %p162_p6  ;;  %s745_s30 = smov [#allocation5]  }
   0xf   : > { %s178_s5 = sshll.u32 %s745_s30, 4  ;;  %p457_p10 = scmp.ge.s32.totalorder %s743_s20, 2  ;;  %s179_s5 = int_to_ptr.vmem [resolvable:$true] %s178_s5 }
  0x10   : > { %p491_p8 = pneg %p831_p7  ;;  %s190_s8 = sshll.u32 %s944_s2, 4  ;;  %s191_s8 = int_to_ptr.hbm [resolvable:$true] %s190_s8 }
  0x11   : > { %s947_s9 = smov 128   ;;  %s747_s10 = smov 8  }
  0x12   : > { %p492_p9 = pnand %p491_p8, %p812_p1  ;;  %s748_s11 = smov [#allocation7]  }
  0x13   : > { %s176_s28 = sshll.u32 %s952_s1, 4  ;;  %s192_s12 = sshll.u32 %s748_s11, 4  ;;  %s177_s28 = int_to_ptr.hbm [resolvable:$true] %s176_s28  ;;  %s193_s12 = int_to_ptr.vmem [resolvable:$true] %s192_s12 }
  0x14   : > { %494 = dma.hbm_to_vmem [thread:$0]  (!%p492_p9), %s177_s28, 256, %s179_s5, [#allocation6], %s947_s9, %s947_s9, %s747_s10  }
  0x15   : > { %497 = dma.hbm_to_vmem [thread:$0]  (!%p492_p9), %s191_s8, 512, %s193_s12, [#allocation6], %s947_s9, %s947_s9, %s747_s10  }
  0x16   : > { %p149_p11 = scmp.eq.s32.totalorder %s452_s21, 1  ;;  %s33_s13 = sadd.s32 1, %s739_s19 }
  0x17   : > { %p35_p12 = scmp.ge.s32.totalorder %s33_s13, 2  ;;  %s42_s14 = sadd.s32 1, %s731_s17 }
  0x18   : > { %p49_p13 = scmp.ne.s32.totalorder %s731_s17, %s727_s16  ;;  %p50_p0 = scmp.eq.s32.totalorder %s743_s20, 0 }
  0x19   : > { %s962_s13 = smov (%p35_p12, %s33_s13), 0  ;;  %p508_p4 = scmp.lt.s32.totalorder %s743_s20, 2 }
  0x1a   : > { %p858_p2 = por %p149_p11, %p49_p13  ;;  %s37_s26 = ssub.s32 %s739_s19, %s962_s13 }
  0x1b   : > { %s209_s27 = sand.u32 1, %s731_s17   ;;  %p40_p6 = scmp.eq.s32.totalorder %s37_s26, 0 }
  0x1c   : > { %p51_p8 = por %p50_p0, %p49_p13  ;;  %s458_s28 = sshll.u32 %s209_s27, 4 }
  0x1d   : > { %s473_s21 = sshll.u32 %s739_s19, 4  ;;  %s213_s11 = scalar_lea.vmem [#allocation2], %s458_s28 }
  0x1e   : > { %s868_s30 = scalar_select %p40_p6, %s731_s17, %s42_s14  }
  0x1f   : > { %s220_s7 = scalar_lea.hbm %s942_s0, %s473_s21  ;;  %s223_s12 = sshll.u32 %s213_s11, 4  ;;  %s224_s12 = int_to_ptr.vmem [resolvable:$true] %s223_s12 }
  0x20   : > { %s221_s8 = sshll.u32 %s220_s7, 4  ;;  %p499_p9 = pnand %p508_p4, %p51_p8  ;;  %s222_s8 = int_to_ptr.hbm [resolvable:$true] %s221_s8 }
  0x21   : > { %s210_s9 = scalar_lea.sflag [#allocation3], %s209_s27  ;;  %s955_s1 = smov 128  }
  0x22   : > { %501 = dma.hbm_to_vmem [thread:$0]  (!%p499_p9), %s222_s8, 256, %s224_s12, %s210_s9, %s955_s1, %s955_s1, %s747_s10  }
  0x23   : > { %235 = sbr.rel (%p831_p7) target bundleno = 184 (0xb8), region = 36  ;;  %s881_s14 = sand.u32 (!%p831_p7), 1, %s727_s16  }
  0x24   : > { %s462_s26 = sshll.u32 (!%p831_p7), %s881_s14, 4  ;;  %s238_s28 = scalar_lea.sflag (!%p831_p7), [#allocation3], %s881_s14 }
  0x25   : > { %s241_s21 = scalar_lea.vmem (!%p831_p7), [#allocation2], %s462_s26 }
  0x28   : > { %710 = dma.done.wait (%p818_p3), %s238_s28, 256  }
  0x29   : > { %712 = vsyncadd (%p818_p3), %s238_s28, 4294967040 }
  0x2a   : > { %714 = dma.done.wait (%p812_p1), [#allocation6], 768  }
  0x2b   : > { %716 = vsyncadd (%p812_p1), [#allocation6], 4294966528  ;;  %v289_v0 = vld [vmem:[#allocation7 + $0x18] sm:$0xff]  ;;  %v288_v1 = vld [vmem:[#allocation7 + $0x10] sm:$0xff]  ;;  %vm294_vm0 = vcmask 261120   ;;  %s474_s1 = sshll.u32 %s735_s18, 4 }
  0x2c   : > { %313 = vmatpush.msra.mxu0 %v289_v0  ;;  %475 = vmatpush.msra.mxu1 %v289_v0  ;;  %v287_v2 = vld [vmem:[#allocation7 + $0x8] sm:$0xff]  ;;  %v280_v3 = vld [vmem:[%s241_s21] sm:$0xff]  ;;  %v283_v6 = vld [vmem:[#allocation5 + $0x8] sm:$0xff]  ;;  %s340_s29 = scalar_lea.hbm %s946_s4, %s474_s1  ;;  %s276_s27 = scalar_lea.vmem [#allocation8], %s462_s26 }
  0x2d   : > { %v282_v4 = vld [vmem:[#allocation5] sm:$0xff]  ;;  %v281_v5 = vld [vmem:[%s241_s21 + $0x8] sm:$0xff]  ;;  %v286_v7 = vld [vmem:[#allocation7] sm:$0xff]  ;;  %s341_s5 = sshll.u32 %s276_s27, 4  ;;  %s343_s6 = sshll.u32 %s340_s29, 4  ;;  %s342_s5 = int_to_ptr.vmem [resolvable:$true] %s341_s5  ;;  %s344_s6 = int_to_ptr.hbm [resolvable:$true] %s343_s6 }
  0x2e   : > { %314 = vmatpush.msra.mxu0 %v288_v1  ;;  %476 = vmatpush.msra.mxu1 %v288_v1  ;;  %v284_v8 = vadd.f32 %v282_v4, %v280_v3  ;;  %v285_v9 = vadd.f32 %v283_v6, %v281_v5  ;;  %v566_v10 = vld [vmem:[%s945_s3] ss:$0 sm:$0xff]  ;;  %s327_s18 = scalar_lea.sflag [#allocation4], %s881_s14  ;;  %s671_s7 = sshra.s32 %s344_s6, 4  ;;  %s672_s7 = int_to_ptr.hbm [resolvable:$true] %s671_s7 }
  0x2f   : > { %s673_s8 = scalar_lea.hbm %s672_s7, 16  ;;  %s677_s26 = scalar_lea.hbm %s946_s4, 32 }
  0x30   : > { %315 = vmatpush.msra.mxu0 %v287_v2  ;;  %477 = vmatpush.msra.mxu1 %v287_v2  ;;  %p674_p1 = scmp.ne.s32.totalorder %s672_s7, %s673_s8  ;;  %p678_p11 = scmp.lt.s32.totalorder %s672_s7, %s946_s4 }
  0x31   : > { %p679_p12 = scmp.lt.s32.totalorder %s677_s26, %s673_s8 }
  0x32   : > { %316 = vmatpush.msra.mxu0 %v286_v7  ;;  %478 = vmatpush.msra.mxu1 %v286_v7  ;;  %p675_p3 = pnand %p674_p1, %p858_p2 }
  0x33   : > { %466 = vmatmul.msk.f32.vlgmr.msra.gmra.mxu0 %vm294_vm0, %v284_v8  ;;  %467 = vmatmul.msk.f32.vlgmr.msra.gmra.mxu1 %vm294_vm0, %v285_v9  ;;  %p680_p13 = por %p679_p12, %p678_p11 }
  0x34   : > { %p676_p7 = pneg %p675_p3 }
  0x36   : > { %p681_p0 = pnand %p680_p13, %p676_p7 }
  0xb0   : > { %v318_v11 = vpop.f32.mrf.mxu0  ;;  %v321_v12 = vpop.f32.mrf.mxu1 }
  0xb1   : > { %v319_v13 = vadd.f32 %v566_v10, %v318_v11  ;;  %v322_v14 = vadd.f32 %v566_v10, %v321_v12 }
  0xb3   : > { %324 = vst.msk [vmem:[%s276_s27] sm:$0xff] %vm294_vm0, %v319_v13 }
  0xb4   : > { %325 = vst.msk [vmem:[%s276_s27 + $0x8] sm:$0xff] %vm294_vm0, %v322_v14 }
  0xb5   : > { %684 = shalt.err (!%p681_p0)
}
  0xb6   : > { %s749_s14 = smov 128   ;;  %s750_s1 = smov 8  }
  0xb7   : > { %489 = dma.vmem_to_hbm [thread:$0]  (%p858_p2), %s342_s5, 256, %s344_s6, %s327_s18, %s749_s14, %s749_s14, %s750_s1  }
  0xb8 PF: > { %s358_s23 = sand.u32 1, %s723_s15   ;;  %p503_p4 = pnand %p457_p10, %p823_p5 }
  0xb9   : > { %s359_s24 = scalar_lea.sflag [#allocation4], %s358_s23 }
  0xba   : > { %p504_p6 = pneg %p503_p4 }
  0xbc   : > { %718 = dma.done.wait (%p504_p6), %s359_s24, 256  }
  0xbd   : > { %720 = vsyncadd (%p504_p6), %s359_s24, 4294967040  ;;  %s21_s20 = sadd.s32 1, %s743_s20   ;;  %s956_s15 = smov %s727_s16 }
  0xbe   : > { %p18_p8 = scmp.ge.s32.totalorder %s21_s20, 4   ;;  %s957_s16 = smov %s731_s17 }
  0xbf   : > { %s958_s17 = smov %s868_s30  ;;  %s959_s18 = smov %s739_s19 }
  0xc0   : > { %s960_s19 = smov %s962_s13  ;;  %20 = sbr.rel (!%p18_p8) target bundleno = 9 (0x9), region = 90 }
  0xc5   :  { %365 = vsyncpa [#allocation3], 1 }
  0xc6   :  { %367 = vsyncpa [#allocation3 + $0x1], 1 }
  0xc7   :  { %368 = vsyncpa [#allocation6], 1 }
  0xc8   :  { %369 = vsyncpa [#allocation4], 1 }
  0xc9   :  { %371 = vsyncpa [#allocation4 + $0x1], 1 }

</bundles_post_ra>
